<compile_context>
chip_gen: v7x
topology: tpu7x:2x2x1
jax: 0.10.0
libtpu: 0.0.40
codegen_flags: <defaults>
</compile_context>

<pallas_src>
import functools

import jax
import jax.numpy as jnp
from jax.experimental import pallas as pl
from jax.experimental.pallas import tpu as pltpu

_IGNORE_INDEX = -100


def _round_up(x, m):
    return ((x + m - 1) // m) * m


def _focal_factor(fm, gamma):
    """fm ** gamma, using repeated multiplies for small integer gamma."""
    g = float(gamma)
    if g.is_integer() and 0.0 <= g <= 8.0:
        gi = int(g)
        if gi == 0:
            return jnp.ones_like(fm)
        out = fm
        for _ in range(gi - 1):
            out = out * fm
        return out
    return jnp.power(fm, g)  # non-integer gamma -> EUP log+exp path


def _focal_loss_kernel(logits_ref, targets_ref, *rest, gamma, has_alpha):
    if has_alpha:
        alpha_t_ref, out_ref = rest
    else:
        (out_ref,) = rest
        alpha_t_ref = None

    logits = logits_ref[...].astype(jnp.float32)   # widen in-register (VPU cast)
    targets = targets_ref[...]                     # (T, 1) int32
    t, c = logits.shape

    # log-softmax along the class (lane) axis.
    # NOTE: on v7x the exp could optionally be evaluated in bf16 (f32 accumulate)
    # to relieve the single EUP slot; kept f32 here for accuracy.
    m = jnp.max(logits, axis=-1, keepdims=True)
    shifted = logits - m
    lse = jnp.log(jnp.sum(jnp.exp(shifted), axis=-1, keepdims=True))

    # Bool match of the target class (no float one-hot / extra multiply).
    # ignore_index (-100) never matches a class id in [0, C), so rows to be
    # ignored simply contribute a 0 numerator and are masked below.
    cls_ids = jax.lax.broadcasted_iota(jnp.int32, (t, c), 1)
    match = cls_ids == targets                                        # (T, C) bool

    log_pt = (jnp.sum(jnp.where(match, shifted, 0.0), axis=-1, keepdims=True)
              - lse)                                                  # (T, 1)
    pt = jnp.exp(log_pt)

    validf = (targets != _IGNORE_INDEX).astype(jnp.float32)           # (T, 1)

    fm = jnp.maximum(1.0 - pt, 0.0)        # clamp: pt can round to >1
    focal = _focal_factor(fm, gamma)
    loss = -focal * log_pt * validf                                   # (T, 1)
    if has_alpha:
        loss = alpha_t_ref[...] * loss     # alpha[target], gathered in wrapper

    loss_sum = jnp.sum(loss)
    cnt = jnp.sum(validf)

    # Lane-dense (8, 128) partial-sum slab: [0,0]=loss_sum, [0,1]=count, rest 0.
    sub = jax.lax.broadcasted_iota(jnp.int32, out_ref.shape, 0)
    lane = jax.lax.broadcasted_iota(jnp.int32, out_ref.shape, 1)
    out_ref[...] = jnp.where(
        (sub == 0) & (lane == 0), loss_sum,
        jnp.where((sub == 0) & (lane == 1), cnt, jnp.float32(0.0)))


def _pick_tile_n(n_rows, n_classes, logits_itemsize, has_alpha):
    """Largest 32-row-aligned tile that fits the scoped-VMEM budget we request."""
    try:
        vmem_phys = int(pltpu.get_tpu_info().vmem_capacity_bytes)
    except Exception:
        vmem_phys = 64 * 1024 * 1024       # conservative (v7x-sized) fallback

    # The limit we actually hand to the compiler; budget tiles against THIS,
    # not physical capacity.
    vmem_limit = int(min(vmem_phys // 2, 64 * 1024 * 1024))
    budget = int(vmem_limit * 0.65)        # headroom for output slabs / slack

    c_pad = _round_up(n_classes, 128)      # lane padding of the logits block
    aux_blocks = 2 if has_alpha else 1     # targets (+ alpha_t) (T,1) blocks
    bytes_per_row = (
        2 * c_pad * logits_itemsize        # double-buffered logits input block
        + 5 * c_pad * 4                    # in-kernel f32 temporaries (widened,
                                           #   shifted, exp, select, one spare)
        + aux_blocks * 2 * 128 * 4         # lane-padded, double-buffered (T,1)
    )
    tile = budget // max(bytes_per_row, 1)

    n_rows32 = _round_up(max(int(n_rows), 1), 32)
    tile = min(int(tile), n_rows32)

    # Keep >= ~8 grid steps when N allows so v7x's two TensorCores both get
    # work under the "parallel" grid axis; nearly free elsewhere for this
    # mem-/EUP-bound kernel.
    min_tile = 32
    if n_rows32 // max(tile, 1) < 8:
        tile = min(tile, max(min_tile, _round_up(pl.cdiv(n_rows32, 8), 32)))

    # Multiple of 32 rows: safe sublane multiple for f32/bf16/int8 blocks.
    tile = max(min_tile, (tile // 32) * 32)
    # TODO(synk): vocab-scale C (>= ~500k) would need class-axis tiling
    # (two-pass / online softmax over C); not handled here.
    return int(tile), vmem_limit


def focal_loss_multiclass(inputs, targets, alpha=None, gamma=2.0,
                          reduction="mean"):
    """JAX/Pallas equivalent of FocalLossMultiClass.forward."""
    c = inputs.shape[-1]
    logits2d = inputs.reshape(-1, c)               # original dtype; widened in-kernel
    n = logits2d.shape[0]
    targets1d = targets.reshape(-1).astype(jnp.int32)
    valid = targets1d != _IGNORE_INDEX
    has_alpha = alpha is not None

    itemsize = jnp.dtype(logits2d.dtype).itemsize
    tile_n, vmem_limit = _pick_tile_n(n, c, itemsize, has_alpha)
    num_tiles = pl.cdiv(n, tile_n)
    n_pad = num_tiles * tile_n

    targets2d = targets1d.reshape(-1, 1)
    if n_pad != n:
        # Padded rows are ignore_index -> 0 loss and 0 count.
        logits2d = jnp.pad(logits2d, ((0, n_pad - n), (0, 0)))
        targets2d = jnp.pad(targets2d, ((0, n_pad - n), (0, 0)),
                            constant_values=_IGNORE_INDEX)

    in_specs = [
        pl.BlockSpec((tile_n, c), lambda i: (i, 0)),
        pl.BlockSpec((tile_n, 1), lambda i: (i, 0)),
    ]
    args = [logits2d, targets2d]
    if has_alpha:
        alpha_arr = jnp.asarray(alpha, jnp.float32).reshape(-1)
        # Gather alpha[target] once in the wrapper (tiny XLA gather, N*4 B of
        # extra HBM) instead of an in-kernel (T, C) multiply + lane reduction.
        alpha_t = alpha_arr[jnp.where(valid, targets1d, 0)].astype(jnp.float32)
        alpha_t = alpha_t.reshape(-1, 1)
        if n_pad != n:
            alpha_t = jnp.pad(alpha_t, ((0, n_pad - n), (0, 0)))
        in_specs.append(pl.BlockSpec((tile_n, 1), lambda i: (i, 0)))
        args.append(alpha_t)

    kernel = functools.partial(_focal_loss_kernel, gamma=float(gamma),
                               has_alpha=has_alpha)

    aux_blocks = 2 if has_alpha else 1
    cost = pl.CostEstimate(
        flops=int(6 * n_pad * c),
        transcendentals=int(n_pad * c),
        bytes_accessed=int(n_pad * c * itemsize + aux_blocks * n_pad * 4
                           + num_tiles * 8 * 128 * 4),
    )

    partials = pl.pallas_call(
        kernel,
        out_shape=jax.ShapeDtypeStruct((num_tiles * 8, 128), jnp.float32),
        grid=(num_tiles,),
        in_specs=in_specs,
        out_specs=pl.BlockSpec((8, 128), lambda i: (i, 0)),
        compiler_params=pltpu.CompilerParams(
            dimension_semantics=("parallel",),
            vmem_limit_bytes=vmem_limit,
        ),
        cost_estimate=cost,
    )(*args)

    loss_sum = jnp.sum(partials[:, 0])
    count = jnp.sum(partials[:, 1])

    if reduction == "mean":
        # If every target is ignore_index this is 0/0 -> NaN, matching
        # PyTorch's mean over an empty tensor.
        return loss_sum / count
    elif reduction == "sum":
        return loss_sum
    else:
        # TODO(synk): reduction='none' returns only the masked (dynamic-shape)
        # per-element losses in PyTorch; not expressible with static shapes.
        raise NotImplementedError("reduction='none' not supported")


def _reference(inputs, targets, alpha=None, gamma=2.0):
    # Pure-JAX reference mirroring the PyTorch code (masked-mean form).
    c = inputs.shape[-1]
    x = inputs.reshape(-1, c).astype(jnp.float32)
    t = targets.reshape(-1)
    valid = t != _IGNORE_INDEX
    log_probs = jax.nn.log_softmax(x, axis=-1)
    t_safe = jnp.where(valid, t, 0)
    log_pt = jnp.take_along_axis(log_probs, t_safe[:, None], axis=-1)[:, 0]
    pt = jnp.exp(log_pt)
    if alpha is not None:
        at = jnp.asarray(alpha, jnp.float32)[t_safe]
        loss = -at * (1.0 - pt) ** gamma * log_pt
    else:
        loss = -((1.0 - pt) ** gamma) * log_pt
    loss = jnp.where(valid, loss, 0.0)
    return jnp.sum(loss) / jnp.sum(valid.astype(jnp.float32))


if __name__ == "__main__":
    key = jax.random.PRNGKey(0)
    k1, k2, k3 = jax.random.split(key, 3)

    batch, seq, num_classes = 2, 8, 10
    inputs = jax.random.normal(k1, (batch, seq, num_classes), dtype=jnp.float32)
    targets = jax.random.randint(k2, (batch, seq), 0, num_classes,
                                 dtype=jnp.int32)
    # Mark a few positions as ignore_index (-100), as the module expects.
    targets = targets.at[0, 0].set(-100)
    targets = targets.at[1, 3].set(-100)

    # No-alpha path (f32 inputs).
    out = focal_loss_multiclass(inputs, targets, alpha=None, gamma=2.0,
                                reduction="mean")
    out = jax.block_until_ready(out)
    ref = _reference(inputs, targets, alpha=None, gamma=2.0)
    assert jnp.allclose(out, ref, rtol=1e-5, atol=1e-6), (out, ref)

    # Alpha (per-class weight) path.
    alpha = jax.random.uniform(k3, (num_classes,), dtype=jnp.float32,
                               minval=0.25, maxval=1.0)
    out_a = focal_loss_multiclass(inputs, targets, alpha=alpha, gamma=2.0,
                                  reduction="mean")
    out_a = jax.block_until_ready(out_a)
    ref_a = _reference(inputs, targets, alpha=alpha, gamma=2.0)
    assert jnp.allclose(out_a, ref_a, rtol=1e-5, atol=1e-6), (out_a, ref_a)

    # bf16 inputs are fed directly to the kernel (widened in-register).
    out_bf = focal_loss_multiclass(inputs.astype(jnp.bfloat16), targets,
                                   alpha=None, gamma=2.0, reduction="mean")
    out_bf = jax.block_until_ready(out_bf)
    ref_bf = _reference(inputs.astype(jnp.bfloat16), targets, alpha=None,
                        gamma=2.0)
    assert jnp.allclose(out_bf, ref_bf, rtol=1e-4, atol=1e-5), (out_bf, ref_bf)

    # 'sum' reduction path.
    out_s = focal_loss_multiclass(inputs, targets, alpha=None, gamma=2.0,
                                  reduction="sum")
    out_s = jax.block_until_ready(out_s)
    ref_s = ref * jnp.sum((targets.reshape(-1) != _IGNORE_INDEX)
                          .astype(jnp.float32))
    assert jnp.allclose(out_s, ref_s, rtol=1e-5, atol=1e-5), (out_s, ref_s)

    print("KERNEL_OK")
</pallas_src>

<mosaic_0001>
module attributes {stable_mosaic.version = 11 : i64} {
  func.func @_focal_loss_kernel(%arg0: i32, %arg1: memref<32x10xf32, #tpu.memory_space<vmem>>, %arg2: memref<32x1xi32, #tpu.memory_space<vmem>>, %arg3: memref<8x128xf32, #tpu.memory_space<vmem>>) attributes {dimension_semantics = [#tpu.dimension_semantics<parallel>], iteration_bounds = array<i64: 1>, scalar_prefetch = 0 : i64, scratch_operands = 0 : i64, tpu.core_type = #tpu.core_type<tc>, window_params = [{transform_indices = @transform_0, window_bounds = array<i64: 32, 10>}, {transform_indices = @transform_1, window_bounds = array<i64: 32, 1>}, {transform_indices = @transform_2, window_bounds = array<i64: 8, 128>}]} {
    %c0 = arith.constant 0 : index
    %c0_0 = arith.constant 0 : index
    %0 = vector.load %arg1[%c0, %c0_0] : memref<32x10xf32, #tpu.memory_space<vmem>>, vector<32x10xf32>
    %c0_1 = arith.constant 0 : index
    %c0_2 = arith.constant 0 : index
    %1 = vector.load %arg2[%c0_1, %c0_2] : memref<32x1xi32, #tpu.memory_space<vmem>>, vector<32x1xi32>
    %cst = arith.constant dense<0xFF800000> : vector<32xf32>
    %2 = vector.multi_reduction <maximumf>, %0, %cst [1] : vector<32x10xf32> to vector<32xf32>
    %3 = vector.shape_cast %2 : vector<32xf32> to vector<32x1xf32>
    %4 = vector.broadcast %3 : vector<32x1xf32> to vector<32x10xf32>
    %5 = arith.subf %0, %4 : vector<32x10xf32>
    %6 = math.exp %5 : vector<32x10xf32>
    %cst_3 = arith.constant dense<0.000000e+00> : vector<32xf32>
    %7 = vector.multi_reduction <add>, %6, %cst_3 [1] : vector<32x10xf32> to vector<32xf32>
    %8 = vector.shape_cast %7 : vector<32xf32> to vector<32x1xf32>
    %9 = math.log %8 : vector<32x1xf32>
    %10 = tpu.iota {dimensions = array<i32: 1>} : vector<32x10xi32>
    %11 = vector.broadcast %1 : vector<32x1xi32> to vector<32x10xi32>
    %12 = arith.cmpi eq, %10, %11 : vector<32x10xi32>
    %cst_4 = arith.constant 0.000000e+00 : f32
    %13 = vector.broadcast %cst_4 : f32 to vector<32x10xf32>
    %14 = arith.select %12, %5, %13 : vector<32x10xi1>, vector<32x10xf32>
    %cst_5 = arith.constant dense<0.000000e+00> : vector<32xf32>
    %15 = vector.multi_reduction <add>, %14, %cst_5 [1] : vector<32x10xf32> to vector<32xf32>
    %16 = vector.shape_cast %15 : vector<32xf32> to vector<32x1xf32>
    %17 = arith.subf %16, %9 : vector<32x1xf32>
    %18 = math.exp %17 : vector<32x1xf32>
    %c-100_i32 = arith.constant -100 : i32
    %19 = vector.broadcast %c-100_i32 : i32 to vector<32x1xi32>
    %20 = arith.cmpi ne, %1, %19 : vector<32x1xi32>
    %21 = arith.extui %20 : vector<32x1xi1> to vector<32x1xi32>
    %22 = arith.sitofp %21 : vector<32x1xi32> to vector<32x1xf32>
    %cst_6 = arith.constant 1.000000e+00 : f32
    %23 = vector.broadcast %cst_6 : f32 to vector<32x1xf32>
    %24 = arith.subf %23, %18 : vector<32x1xf32>
    %cst_7 = arith.constant 0.000000e+00 : f32
    %25 = vector.broadcast %cst_7 : f32 to vector<32x1xf32>
    %26 = arith.maximumf %24, %25 : vector<32x1xf32>
    %27 = arith.mulf %26, %26 : vector<32x1xf32>
    %cst_8 = arith.constant 0.000000e+00 : f32
    %28 = vector.broadcast %cst_8 : f32 to vector<32x1xf32>
    %29 = arith.subf %28, %27 : vector<32x1xf32>
    %30 = arith.mulf %29, %17 : vector<32x1xf32>
    %31 = arith.mulf %30, %22 : vector<32x1xf32>
    %32 = vector.shape_cast %31 : vector<32x1xf32> to vector<1x32x1xf32>
    %cst_9 = arith.constant dense<0.000000e+00> : vector<1xf32>
    %33 = vector.multi_reduction <add>, %32, %cst_9 [1, 2] : vector<1x32x1xf32> to vector<1xf32>
    %34 = vector.shape_cast %33 : vector<1xf32> to vector<1x1x1xf32>
    %35 = vector.extract %34[0, 0, 0] : f32 from vector<1x1x1xf32>
    %36 = vector.shape_cast %22 : vector<32x1xf32> to vector<1x32x1xf32>
    %cst_10 = arith.constant dense<0.000000e+00> : vector<1xf32>
    %37 = vector.multi_reduction <add>, %36, %cst_10 [1, 2] : vector<1x32x1xf32> to vector<1xf32>
    %38 = vector.shape_cast %37 : vector<1xf32> to vector<1x1x1xf32>
    %39 = vector.extract %38[0, 0, 0] : f32 from vector<1x1x1xf32>
    %40 = tpu.iota {dimensions = array<i32: 0>} : vector<8x128xi32>
    %41 = tpu.iota {dimensions = array<i32: 1>} : vector<8x128xi32>
    %c0_i32 = arith.constant 0 : i32
    %42 = vector.broadcast %c0_i32 : i32 to vector<8x128xi32>
    %43 = arith.cmpi eq, %40, %42 : vector<8x128xi32>
    %c0_i32_11 = arith.constant 0 : i32
    %44 = vector.broadcast %c0_i32_11 : i32 to vector<8x128xi32>
    %45 = arith.cmpi eq, %41, %44 : vector<8x128xi32>
    %46 = arith.andi %43, %45 : vector<8x128xi1>
    %c0_i32_12 = arith.constant 0 : i32
    %47 = vector.broadcast %c0_i32_12 : i32 to vector<8x128xi32>
    %48 = arith.cmpi eq, %40, %47 : vector<8x128xi32>
    %c1_i32 = arith.constant 1 : i32
    %49 = vector.broadcast %c1_i32 : i32 to vector<8x128xi32>
    %50 = arith.cmpi eq, %41, %49 : vector<8x128xi32>
    %51 = arith.andi %48, %50 : vector<8x128xi1>
    %cst_13 = arith.constant 0.000000e+00 : f32
    %52 = vector.broadcast %39 : f32 to vector<8x128xf32>
    %53 = vector.broadcast %cst_13 : f32 to vector<8x128xf32>
    %54 = arith.select %51, %52, %53 : vector<8x128xi1>, vector<8x128xf32>
    %55 = vector.broadcast %35 : f32 to vector<8x128xf32>
    %56 = arith.select %46, %55, %54 : vector<8x128xi1>, vector<8x128xf32>
    %c0_14 = arith.constant 0 : index
    %c0_15 = arith.constant 0 : index
    %57 = vector.load %arg3[%c0_14, %c0_15] : memref<8x128xf32, #tpu.memory_space<vmem>>, vector<8x128xf32>
    tpu.vector_store %arg3[%c0_14, %c0_15], %56 {strides = array<i32>} : memref<8x128xf32, #tpu.memory_space<vmem>>, vector<8x128xf32>,
    return
  }
  func.func @transform_0(%arg0: i32) -> (i32, i32) {
    %c0_i32 = arith.constant 0 : i32
    %c0_i32_0 = arith.constant 0 : i32
    return %arg0, %c0_i32 : i32, i32
  }
  func.func @transform_1(%arg0: i32) -> (i32, i32) {
    %c0_i32 = arith.constant 0 : i32
    %c0_i32_0 = arith.constant 0 : i32
    return %arg0, %c0_i32 : i32, i32
  }
  func.func @transform_2(%arg0: i32) -> (i32, i32) {
    %c0_i32 = arith.constant 0 : i32
    %c0_i32_0 = arith.constant 0 : i32
    return %arg0, %c0_i32 : i32, i32
  }
}

</mosaic_0001>

<bundles_post_ra>
// kernel: tpu_custom_call.1
= control target key start
LH: loop header
LB: loop body
LE: loop exit
PB: predicated region body
PF: predicated region fallthrough
CT: control target
= control target key end

     0   :  { %vm20_vm0 = vcmask 80896   ;;  %v267_v6 = vmov 0   ;;  %s375_s0 = inlined_call_operand.vmem [shape: f32[32,10], index: 0, kind: input, shape index: {}]   ;;  %s376_s1 = inlined_call_operand.vmem [shape: s32[32,1], index: 1, kind: input, shape index: {}]   ;;  %s377_s2 = inlined_call_operand.hbm [shape: f32[8,128], index: 2, kind: output, shape index: {}]  }
   0x1   :  { %v14_v0 = vld [vmem:[%s375_s0 + $0x10] sm:$0xff]  ;;  %v12_v1 = vld [vmem:[%s375_s0] sm:$0xff]  ;;  %v15_v2 = vld [vmem:[%s375_s0 + $0x18] sm:$0xff]  ;;  %218 = vset.pattern.permute.xlu1 %v267_v6  ;;  %217 = vset.pattern.permute.xlu0 %v267_v6 }
   0x2   :  { %v27_v3 = vsel %vm20_vm0, %v14_v0, -inf  ;;  %v21_v4 = vsel %vm20_vm0, %v12_v1, -inf  ;;  %v13_v5 = vld [vmem:[%s375_s0 + $0x8] sm:$0xff]  ;;  %v30_v7 = vsel %vm20_vm0, %v15_v2, -inf }
   0x3   :  { %28 = vmax.xlane.f32.xlu1 %v27_v3  ;;  %22 = vmax.xlane.f32.xlu0 %v21_v4  ;;  %v24_v8 = vsel %vm20_vm0, %v13_v5, -inf }
   0x4   :  { %7 = vsyncpa [#allocation3], 0  ;;  %v17_v9 = vld [vmem:[%s376_s1 + $0x8] sm:$0xff]  ;;  %v307_v10 = vld [vmem:[%s376_s1 + $0x10] sm:$0xff]  ;;  %v65_v26 = vlaneseq  ;;  %v268_v47 = vmov 0.0   ;;  %vm147_vm7 = vcmask 7168  }
   0x5   :  { %v16_v11 = vld [vmem:[%s376_s1] sm:$0xff]  ;;  %v316_v12 = vld [vmem:[%s376_s1 + $0x18] sm:$0xff]  ;;  %vm112_vm5 = vcmp.ne.s32.totalorder %v17_v9, 4294967196  ;;  %vm113_vm8 = vcmp.ne.s32.totalorder %v307_v10, 4294967196  ;;  %s269_s24 = smov [#allocation2]  }
   0x6   :  { %v320_v30 = vand.u32 127, %v65_v26  ;;  %vm111_vm6 = vcmp.ne.s32.totalorder %v16_v11, 4294967196  ;;  %v334_v48 = vsel %vm112_vm5, 1.0, %v268_v47  ;;  %v343_v52 = vsel %vm113_vm8, 1.0, %v268_v47  ;;  %s198_s25 = sshll.u32 %s269_s24, 4  ;;  %s199_s25 = int_to_ptr.vmem [resolvable:$true] %s198_s25 }
   0x7   :  { %31 = vmax.xlane.f32.xlu1 %v30_v7  ;;  %25 = vmax.xlane.f32.xlu0 %v24_v8  ;;  %v336_v49 = vsel %vm111_vm6, 1.0, %v268_v47  ;;  %v165_v50 = vsel %vm147_vm7, %v334_v48, 0.0  ;;  %vm114_vm9 = vcmp.ne.s32.totalorder %v316_v12, 4294967196  ;;  %v167_v54 = vsel %vm147_vm7, %v343_v52, 0.0  ;;  %s243_s27 = scalar_lea.vmem %s199_s25, 128  ;;  %p248_p1 = scmp.lt.s32.totalorder %s199_s25, %s199_s25 }
   0x8   :  { %v164_v51 = vsel %vm147_vm7, %v336_v49, 0.0  ;;  %v348_v55 = vsel %vm114_vm9, 1.0, %v268_v47  ;;  %vm185_vm11 = vcmp.eq.s32.totalorder %v320_v30, 1  ;;  %vm183_vm12 = vcmp.eq.s32.totalorder %v320_v30, 0  ;;  %p244_p0 = scmp.ne.s32.totalorder %s199_s25, %s243_s27  ;;  %p249_p2 = scmp.lt.s32.totalorder %s243_s27, %s243_s27 }
   0x9   :  { %v166_v53 = vadd.f32 %v165_v50, %v164_v51  ;;  %v169_v57 = vsel %vm147_vm7, %v348_v55, 0.0 }
   0xa   :  { %p250_p3 = por %p249_p2, %p248_p1 }
   0xb   :  { %v168_v56 = vadd.f32 %v167_v54, %v166_v53 }
   0xc   :  { %p251_p4 = pnand %p250_p3, %p244_p0 }
   0xd   :  { %v170_v58 = vadd.f32 %v169_v57, %v168_v56 }
  0x18   :  { %71 = vperm.xlu1 %218, %v17_v9  }
  0x1c   :  { %74 = vperm.xlu1 %218, %v307_v10  }
  0x1d   :  { %68 = vperm.xlu0 %217, %v16_v11  }
  0x20   :  { %77 = vperm.xlu1 %218, %v316_v12  }
  0x90   :  { %v29_v13 = vpop.xlane.xlu1 %28  ;;  %v23_v14 = vpop.xlane.xlu0 %22 }
  0x91   :  { %v35_v15 = vsub.f32 %v14_v0, %v29_v13  ;;  %v33_v16 = vsub.f32 %v12_v1, %v23_v14 }
  0x93   :  { %v41_v17 = vmul.f32 1.442695, %v35_v15  ;;  %v37_v18 = vmul.f32 1.442695, %v33_v16 }
  0x94   :  { %v32_v19 = vpop.xlane.xlu1 %31  ;;  %v26_v20 = vpop.xlane.xlu0 %25 }
  0x95   :  { %219 = vpow2.f32 %v41_v17  ;;  %v36_v21 = vsub.f32 %v15_v2, %v32_v19  ;;  %v34_v22 = vsub.f32 %v13_v5, %v26_v20 }
  0x96   :  { %221 = vpow2.f32 %v37_v18 }
  0x97   :  { %v43_v23 = vmul.f32 1.442695, %v36_v21  ;;  %v39_v24 = vmul.f32 1.442695, %v34_v22 }
  0x98   :  { %v72_v25 = vpop.permute.xlu1 %71 }
  0x99   :  { %223 = vpow2.f32 %v43_v23  ;;  %vm80_vm3 = vcmp.eq.s32.totalorder %v320_v30, %v72_v25 }
  0x9a   :  { %225 = vpow2.f32 %v39_v24  ;;  %v84_v43 = vsel %vm80_vm3, %v34_v22, 0.0 }
  0x9b   :  { %v90_v44 = vsel %vm20_vm0, %v84_v43, 0.0 }
  0x9c   :  { %v75_v29 = vpop.permute.xlu1 %74  ;;  %v69_v35 = vpop.permute.xlu0 %68 }
  0x9d   :  { %vm81_vm1 = vcmp.eq.s32.totalorder %v320_v30, %v75_v29  ;;  %vm79_vm2 = vcmp.eq.s32.totalorder %v320_v30, %v69_v35 }
  0x9e   :  { %v85_v37 = vsel %vm81_vm1, %v35_v15, 0.0  ;;  %v83_v40 = vsel %vm79_vm2, %v33_v16, 0.0 }
  0x9f   :  { %v220_v27 = vpop.eup %219  ;;  %v93_v39 = vsel %vm20_vm0, %v85_v37, 0.0  ;;  %v87_v42 = vsel %vm20_vm0, %v83_v40, 0.0 }
  0xa0   :  { %v222_v28 = vpop.eup %221  ;;  %v51_v33 = vsel %vm20_vm0, %v220_v27, 0.0  ;;  %v78_v41 = vpop.permute.xlu1 %77 }
  0xa1   :  { %v45_v31 = vsel %vm20_vm0, %v222_v28, 0.0  ;;  %vm82_vm4 = vcmp.eq.s32.totalorder %v320_v30, %v78_v41 }
  0xa2   :  { %46 = vadd.xlane.f32.xlu1 %v45_v31  ;;  %v86_v45 = vsel %vm82_vm4, %v36_v21, 0.0 }
  0xa3   :  { %v224_v32 = vpop.eup %223  ;;  %v96_v46 = vsel %vm20_vm0, %v86_v45, 0.0 }
  0xa4   :  { %v226_v34 = vpop.eup %225  ;;  %v54_v38 = vsel %vm20_vm0, %v224_v32, 0.0 }
  0xa5   :  { %v48_v36 = vsel %vm20_vm0, %v226_v34, 0.0 }
  0xa6   :  { %52 = vadd.xlane.f32.xlu1 %v51_v33  ;;  %49 = vadd.xlane.f32.xlu0 %v48_v36 }
  0xaa   :  { %55 = vadd.xlane.f32.xlu1 %v54_v38  ;;  %94 = vadd.xlane.f32.xlu0 %v93_v39 }
  0xae   :  { %88 = vadd.xlane.f32.xlu1 %v87_v42 }
  0xb2   :  { %91 = vadd.xlane.f32.xlu1 %v90_v44 }
  0xb6   :  { %97 = vadd.xlane.f32.xlu1 %v96_v46 }
  0xba   :  { %171 = vadd.xlane.f32.xlu1 %v170_v58 }
 0x12f   :  { %v47_v59 = vpop.xlane.xlu1 %46 }
 0x130   :  { %227 = vlog2.f32 %v47_v59 }
 0x133   :  { %v53_v60 = vpop.xlane.xlu1 %52  ;;  %v50_v61 = vpop.xlane.xlu0 %49 }
 0x134   :  { %229 = vlog2.f32 %v53_v60 }
 0x135   :  { %231 = vlog2.f32 %v50_v61 }
 0x137   :  { %v56_v62 = vpop.xlane.xlu1 %55  ;;  %v95_v8 = vpop.xlane.xlu0 %94 }
 0x138   :  { %233 = vlog2.f32 %v56_v62 }
 0x13a   :  { %v228_v63 = vpop.eup %227 }
 0x13b   :  { %v58_v0 = vmul.f32 0.6931472, %v228_v63  ;;  %v89_v1 = vpop.xlane.xlu1 %88 }
 0x13d   :  { %v99_v2 = vsub.f32 %v89_v1, %v58_v0 }
 0x13e   :  { %v230_v3 = vpop.eup %229 }
 0x13f   :  { %v232_v4 = vpop.eup %231  ;;  %v62_v5 = vmul.f32 0.6931472, %v230_v3  ;;  %v103_v6 = vmul.f32 1.442695, %v99_v2  ;;  %v92_v7 = vpop.xlane.xlu1 %91 }
 0x140   :  { %v60_v9 = vmul.f32 0.6931472, %v232_v4 }
 0x141   :  { %v101_v10 = vsub.f32 %v95_v8, %v62_v5  ;;  %235 = vpow2.f32 %v103_v6  ;;  %v181_v6 = vshrl.u32 %v65_v26, 7 }
 0x142   :  { %v234_v11 = vpop.eup %233  ;;  %v100_v12 = vsub.f32 %v92_v7, %v60_v9 }
 0x143   :  { %v107_v13 = vmul.f32 1.442695, %v101_v10  ;;  %v64_v14 = vmul.f32 0.6931472, %v234_v11  ;;  %v98_v15 = vpop.xlane.xlu1 %97  ;;  %vm182_vm10 = vcmp.eq.s32.totalorder %v181_v6, 0 }
 0x144   :  { %v105_v16 = vmul.f32 1.442695, %v100_v12  ;;  %vm186_vm13 = vmand %vm182_vm10, %vm185_vm11 }
 0x145   :  { %237 = vpow2.f32 %v107_v13  ;;  %v102_v17 = vsub.f32 %v98_v15, %v64_v14  ;;  %vm184_vm14 = vmand %vm182_vm10, %vm183_vm12 }
 0x146   :  { %239 = vpow2.f32 %v105_v16 }
 0x147   :  { %v109_v18 = vmul.f32 1.442695, %v102_v17  ;;  %v172_v59 = vpop.xlane.xlu1 %171 }
 0x148   :  { %v173_v60 = vrot.slane %v172_v59, 4 }
 0x149   :  { %241 = vpow2.f32 %v109_v18 }
 0x14b   :  { %v236_v19 = vpop.eup %235 }
 0x14c   :  { %v123_v20 = vsub.f32 1.0, %v236_v19 }
 0x14e   :  { %v127_v21 = vmax.f32 %v123_v20, 0.0 }
 0x14f   :  { %v238_v22 = vpop.eup %237 }
 0x150   :  { %v240_v23 = vpop.eup %239  ;;  %v125_v24 = vsub.f32 1.0, %v238_v22  ;;  %v131_v25 = vmul.f32 %v127_v21, %v127_v21 }
 0x151   :  { %v124_v27 = vsub.f32 1.0, %v240_v23 }
 0x152   :  { %v129_v28 = vmax.f32 %v125_v24, 0.0  ;;  %v135_v29 = vsub.f32 0.0, %v131_v25 }
 0x153   :  { %v242_v31 = vpop.eup %241  ;;  %v128_v32 = vmax.f32 %v124_v27, 0.0 }
 0x154   :  { %v133_v33 = vmul.f32 %v129_v28, %v129_v28  ;;  %v126_v34 = vsub.f32 1.0, %v242_v31  ;;  %v139_v35 = vmul.f32 %v135_v29, %v99_v2 }
 0x155   :  { %v132_v36 = vmul.f32 %v128_v32, %v128_v32 }
 0x156   :  { %v137_v37 = vsub.f32 0.0, %v133_v33  ;;  %v130_v38 = vmax.f32 %v126_v34, 0.0  ;;  %v143_v42 = vmul.f32 %v336_v49, %v139_v35 }
 0x157   :  { %v136_v39 = vsub.f32 0.0, %v132_v36 }
 0x158   :  { %v141_v40 = vmul.f32 %v137_v37, %v101_v10  ;;  %v134_v41 = vmul.f32 %v130_v38, %v130_v38  ;;  %v148_v50 = vsel %vm147_vm7, %v143_v42, 0.0 }
 0x159   :  { %v140_v43 = vmul.f32 %v136_v39, %v100_v12 }
 0x15a   :  { %v138_v44 = vsub.f32 0.0, %v134_v41  ;;  %v145_v45 = vmul.f32 %v343_v52, %v141_v40  ;;  %v174_v52 = vadd.f32 %v173_v60, %v172_v59 }
 0x15b   :  { %v144_v46 = vmul.f32 %v334_v48, %v140_v43 }
 0x15c   :  { %v142_v47 = vmul.f32 %v138_v44, %v102_v17  ;;  %v151_v56 = vsel %vm147_vm7, %v145_v45, 0.0  ;;  %v175_v61 = vrot.slane %v174_v52, 2 }
 0x15d   :  { %v149_v51 = vsel %vm147_vm7, %v144_v46, 0.0 }
 0x15e   :  { %v146_v53 = vmul.f32 %v348_v55, %v142_v47  ;;  %v150_v54 = vadd.f32 %v149_v51, %v148_v50  ;;  %v176_v0 = vadd.f32 %v175_v61, %v174_v52 }
 0x160   :  { %v152_v57 = vadd.f32 %v151_v56, %v150_v54  ;;  %v153_v58 = vsel %vm147_vm7, %v146_v53, 0.0  ;;  %v177_v3 = vrot.slane %v176_v0, 1 }
 0x162   :  { %v154_v49 = vadd.f32 %v153_v58, %v152_v57  ;;  %v178_v5 = vadd.f32 %v177_v3, %v176_v0 }
 0x164   :  { %155 = vadd.xlane.f32.xlu0 %v154_v49 }
 0x1f1   :  { %v156_v48 = vpop.xlane.xlu0 %155 }
 0x1f2   :  { %v157_v62 = vrot.slane %v156_v48, 4 }
 0x1f4   :  { %v158_v63 = vadd.f32 %v157_v62, %v156_v48 }
 0x1f6   :  { %v159_v1 = vrot.slane %v158_v63, 2 }
 0x1f8   :  { %v160_v2 = vadd.f32 %v159_v1, %v158_v63 }
 0x1fa   :  { %v161_v55 = vrot.slane %v160_v2, 1 }
 0x1fc   :  { %v162_v4 = vadd.f32 %v161_v55, %v160_v2 }
 0x1fe   :  { %210 = vpush %v162_v4 }
 0x1ff   :  { %212 = vpush %v178_v5 }
 0x22f   :  { %s211_s1 = spop %210 }
 0x230   :  { %v189_v7 = vstv %s211_s1  ;;  %s213_s26 = spop %212 }
 0x231   :  { %v187_v8 = vstv %s213_s26 }
 0x232   :  { %v188_v9 = vsel %vm186_vm13, %v187_v8, 0.0 }
 0x233   :  { %v190_v10 = vsel %vm184_vm14, %v189_v7, %v188_v9 }
 0x234   :  { %191 = vst [vmem:[#allocation2] sm:$0xff] %v190_v10 }
 0x235   :  { %254 = shalt.err (!%p251_p4)
}
 0x236   :  { %s255_s30 = scalar_lea.hbm %s377_s2, 128 }
 0x237   :  { %p256_p5 = scmp.ne.s32.totalorder %s377_s2, %s255_s30  ;;  %p259_p6 = scmp.lt.u32.totalorder %s255_s30, %s377_s2 }
 0x239   :  { %p261_p7 = pnand %p259_p6, %p256_p5 }
 0x23b   :  { %264 = shalt.err (!%p261_p7)
}
 0x23c   :  { %201 = dma.vmem_to_hbm [thread:$0]  %s199_s25, 128, %s377_s2, [#allocation3]  }
 0x23d   :  { %265 = dma.done.wait [#allocation3], 128  }
 0x23e   :  { %266 = vsyncadd [#allocation3], 4294967168 }
 0x23f   :  { %205 = vsyncpa [#allocation3], 1 }

</bundles_post_ra>
